<compile_context>
chip_gen: v7x
topology: tpu7x:2x2x1
jax: 0.10.0
libtpu: 0.0.40
codegen_flags: <defaults>
</compile_context>

<pallas_src>
import math

import jax
import jax.numpy as jnp
from jax.experimental import pallas as pl
from jax.experimental.pallas import tpu as pltpu


def _round_up(x: int, m: int) -> int:
    return ((x + m - 1) // m) * m


def _node_tile(n: int):
    """Row/K tile over the node dimension: 128 for tiny graphs, else 256."""
    if n <= 128:
        return 128, 128
    tm = 256
    return tm, _round_up(n, tm)


def _feat_tiles(fin: int):
    """Reduction tile over Fin: single step when small, 512-wide otherwise."""
    fin_pad = _round_up(fin, 128)
    if fin_pad <= 512:
        return fin_pad, fin_pad
    return 512, _round_up(fin, 512)


def _vmem_budget_bytes() -> int:
    """Per-core VMEM budget with compiler headroom (generation-aware)."""
    try:
        cap = int(pltpu.get_tpu_info().vmem_capacity_bytes)
    except Exception:
        cap = 64 * 1024 * 1024            # conservative (v7x per-TC) fallback
    return max(cap - 16 * 1024 * 1024, 32 * 1024 * 1024)


def _cparams(grid_rank: int, vmem_limit: int):
    sem = ("parallel",) + ("arbitrary",) * (grid_rank - 1)
    return pltpu.CompilerParams(dimension_semantics=sem,
                                vmem_limit_bytes=vmem_limit)


# ---------------------------------------------------------------------------
# Stage 1: HW = (H @ W) * norm      -> [N, Fout] emitted as bf16
# ---------------------------------------------------------------------------
def _hw_kernel_single(h_ref, w_ref, norm_ref, hw_ref):
    hw = jnp.dot(h_ref[...], w_ref[...], preferred_element_type=jnp.float32)
    hw_ref[...] = (hw * norm_ref[...].astype(jnp.float32)).astype(hw_ref.dtype)


def _make_hw_kernel_tiled(nk: int):
    def kernel(h_ref, w_ref, norm_ref, hw_ref, acc_ref):
        k = pl.program_id(1)

        @pl.when(k == 0)
        def _():
            acc_ref[...] = jnp.zeros_like(acc_ref)

        acc_ref[...] += jnp.dot(h_ref[...], w_ref[...],
                                preferred_element_type=jnp.float32)

        @pl.when(k == nk - 1)
        def _():
            hw_ref[...] = (acc_ref[...] *
                           norm_ref[...].astype(jnp.float32)).astype(hw_ref.dtype)

    return kernel


# ---------------------------------------------------------------------------
# Stage 2: OUT = relu(norm * (A @ HW) + bias)   (tiled adjacency matmul)
# ---------------------------------------------------------------------------
def _make_agg_kernel(apply_relu: bool, nk: int, tk: int, hw_resident: bool):
    def kernel(adj_ref, hw_ref, norm_ref, b_ref, out_ref):
        k = pl.program_id(1)

        @pl.when(k == 0)
        def _():
            out_ref[...] = jnp.zeros_like(out_ref)

        a = adj_ref[...].astype(jnp.bfloat16)        # int8 HBM -> bf16 MXU input
        if hw_resident:
            start = pl.multiple_of(k * tk, tk)
            hw = hw_ref[pl.ds(start, tk), :]         # slice the VMEM-pinned HW
        else:
            hw = hw_ref[...]
        out_ref[...] += jnp.dot(a, hw, preferred_element_type=jnp.float32)

        @pl.when(k == nk - 1)
        def _():
            out = out_ref[...] * norm_ref[...].astype(jnp.float32)
            out = out + b_ref[...].astype(jnp.float32)
            if apply_relu:
                out = jnp.maximum(out, 0.0)
            out_ref[...] = out

    return kernel


def gcn_layer(h, weight, adj, norm, bias, *, dropout=0.0, seed=0,
              apply_relu=True, adj_dtype=jnp.int8):
    """Pallas GCN layer.

    h:[N,Fin]  weight:[Fin,Fout]  adj:[N,N] (0/1)  norm:[N,1]  bias:[1,Fout].
    Pass adj_dtype=jnp.bfloat16 if the adjacency carries non-binary weights.
    """
    N, Fin = h.shape
    Fout = weight.shape[1]
    f32, bf16 = jnp.float32, jnp.bfloat16

    # Dropout (training only), fused by XLA into the pad/bf16-cast of H below.
    h = h.astype(f32)
    if dropout > 0.0:
        rate = float(dropout)
        keep = jax.random.bernoulli(jax.random.PRNGKey(seed),
                                    p=1.0 - rate, shape=h.shape)
        h = jnp.where(keep, h * (1.0 / (1.0 - rate)), 0.0)

    TM, n_pad = _node_tile(N)
    TK = TM
    TK1, fin_pad = _feat_tiles(Fin)
    fout_pad = _round_up(Fout, 128)          # lane-dense output width

    # Pad + cast inputs.  H and W are MXU inputs -> bf16; adjacency stays at
    # 1 byte/element (exact for 0/1 graphs); norm/bias stay f32.
    h_p = jnp.zeros((n_pad, fin_pad), bf16).at[:N, :Fin].set(h.astype(bf16))
    w_p = jnp.zeros((fin_pad, fout_pad), bf16).at[:Fin, :Fout].set(weight.astype(bf16))
    if adj.shape == (n_pad, n_pad) and adj.dtype == jnp.dtype(adj_dtype):
        adj_p = adj          # caller already provided a padded, quantized adjacency
    else:
        adj_p = jnp.zeros((n_pad, n_pad), adj_dtype).at[:N, :N].set(adj.astype(adj_dtype))
    norm_p = jnp.zeros((n_pad, 1), f32).at[:N, :].set(norm.reshape(N, 1).astype(f32))
    b_p = jnp.zeros((1, fout_pad), f32).at[:, :Fout].set(bias.reshape(1, Fout).astype(f32))

    budget = _vmem_budget_bytes()

    # ---- stage 1: HW = (H @ W) * norm ---------------------------------------
    nk1 = fin_pad // TK1
    hw_out_shape = jax.ShapeDtypeStruct((n_pad, fout_pad), bf16)
    if nk1 == 1:
        hw = pl.pallas_call(
            _hw_kernel_single,
            grid=(n_pad // TM,),
            in_specs=[
                pl.BlockSpec((TM, fin_pad), lambda i: (i, 0)),
                pl.BlockSpec((fin_pad, fout_pad), lambda i: (0, 0)),  # W resident
                pl.BlockSpec((TM, 1), lambda i: (i, 0)),
            ],
            out_specs=pl.BlockSpec((TM, fout_pad), lambda i: (i, 0)),
            out_shape=hw_out_shape,
            compiler_params=_cparams(1, budget),
        )(h_p, w_p, norm_p)
    else:
        hw = pl.pallas_call(
            _make_hw_kernel_tiled(nk1),
            grid=(n_pad // TM, nk1),
            in_specs=[
                pl.BlockSpec((TM, TK1), lambda i, k: (i, k)),
                pl.BlockSpec((TK1, fout_pad), lambda i, k: (k, 0)),
                pl.BlockSpec((TM, 1), lambda i, k: (i, 0)),
            ],
            out_specs=pl.BlockSpec((TM, fout_pad), lambda i, k: (i, 0)),
            scratch_shapes=[pltpu.VMEM((TM, fout_pad), jnp.float32)],
            out_shape=hw_out_shape,
            compiler_params=_cparams(2, budget),
        )(h_p, w_p, norm_p)

    # ---- stage 2: OUT = relu(norm * (A @ HW) + bias) -------------------------
    nk2 = n_pad // TK
    hw_bytes = n_pad * fout_pad * 2
    adj_tile_bytes = TM * TK * jnp.dtype(adj_dtype).itemsize
    out_tile_bytes = TM * fout_pad * 4
    # Conservative footprint: assume every input is double-buffered.
    resident_footprint = (2 * hw_bytes + 2 * adj_tile_bytes + 2 * out_tile_bytes
                          + 4 * (TM + fout_pad) * 4)
    hw_resident = resident_footprint <= int(0.8 * budget)

    hw_spec = (pl.BlockSpec((n_pad, fout_pad), lambda i, k: (0, 0)) if hw_resident
               else pl.BlockSpec((TK, fout_pad), lambda i, k: (k, 0)))

    out_p = pl.pallas_call(
        _make_agg_kernel(apply_relu, nk2, TK, hw_resident),
        grid=(n_pad // TM, nk2),
        in_specs=[
            pl.BlockSpec((TM, TK), lambda i, k: (i, k)),      # adjacency, 1 B/elem
            hw_spec,                                          # HW (resident or streamed)
            pl.BlockSpec((TM, 1), lambda i, k: (i, 0)),       # norm rows
            pl.BlockSpec((1, fout_pad), lambda i, k: (0, 0)), # bias
        ],
        out_specs=pl.BlockSpec((TM, fout_pad), lambda i, k: (i, 0)),
        out_shape=jax.ShapeDtypeStruct((n_pad, fout_pad), f32),
        compiler_params=_cparams(2, budget),
    )(adj_p, hw, norm_p, b_p)

    return out_p[:N, :Fout]


def gcn_reference(h, weight, adj, norm, bias, apply_relu=True):
    hw = (h @ weight) * norm
    agg = (adj @ hw) * norm
    out = agg + bias
    return jnp.maximum(out, 0.0) if apply_relu else out


if __name__ == "__main__":
    key = jax.random.PRNGKey(0)
    k_h, k_w, k_b, k_a = jax.random.split(key, 4)

    N, in_feats, out_feats = 64, 32, 32

    # Node features.
    h = jax.random.normal(k_h, (N, in_feats), dtype=jnp.float32)

    # Parameters, initialized like reset_parameters(): uniform(-stdv, stdv).
    stdv = 1.0 / math.sqrt(out_feats)
    weight = jax.random.uniform(k_w, (in_feats, out_feats), minval=-stdv,
                                maxval=stdv, dtype=jnp.float32)
    bias = jax.random.uniform(k_b, (1, out_feats), minval=-stdv, maxval=stdv,
                              dtype=jnp.float32)

    # Synthetic graph: random symmetric 0/1 adjacency with self-loops; norm = deg^{-1/2}.
    a = (jax.random.uniform(k_a, (N, N)) < 0.1).astype(jnp.float32)
    adj = jnp.clip(a + a.T + jnp.eye(N, dtype=jnp.float32), 0.0, 1.0)
    deg = adj.sum(axis=1, keepdims=True)
    norm = 1.0 / jnp.sqrt(deg)

    # Eval path (dropout disabled): must match the dense f32 reference up to
    # bf16-MXU tolerance.
    out = gcn_layer(h, weight, adj, norm, bias, dropout=0.0, seed=0, apply_relu=True)
    out = jax.block_until_ready(out)
    ref = gcn_reference(h, weight, adj, norm, bias, apply_relu=True)
    assert out.shape == ref.shape
    assert jnp.allclose(out, ref, atol=2e-2, rtol=2e-2), "mismatch vs reference"

    # Training path: dropout mask generated in the wrapper (deterministic seed).
    out_do = gcn_layer(h, weight, adj, norm, bias, dropout=0.5, seed=123, apply_relu=True)
    out_do = jax.block_until_ready(out_do)
    assert bool(jnp.isfinite(out_do).all()), "non-finite output on dropout path"

    print("KERNEL_OK")
</pallas_src>

<mosaic_0001>
module attributes {stable_mosaic.version = 11 : i64} {
  func.func @_hw_kernel_single(%arg0: i32, %arg1: memref<128x128xbf16, #tpu.memory_space<vmem>>, %arg2: memref<128x128xbf16, #tpu.memory_space<vmem>>, %arg3: memref<128x1xf32, #tpu.memory_space<vmem>>, %arg4: memref<128x128xbf16, #tpu.memory_space<vmem>>) attributes {dimension_semantics = [#tpu.dimension_semantics<parallel>], iteration_bounds = array<i64: 1>, scalar_prefetch = 0 : i64, scratch_operands = 0 : i64, tpu.core_type = #tpu.core_type<tc>, window_params = [{transform_indices = @transform_0, window_bounds = array<i64: 128, 128>}, {pipeline_mode = #tpu.pipeline_mode<synchronous>, transform_indices = @transform_1, window_bounds = array<i64: 128, 128>}, {transform_indices = @transform_2, window_bounds = array<i64: 128, 1>}, {transform_indices = @transform_3, window_bounds = array<i64: 128, 128>}]} {
    %c0 = arith.constant 0 : index
    %c0_0 = arith.constant 0 : index
    %0 = vector.load %arg1[%c0, %c0_0] : memref<128x128xbf16, #tpu.memory_space<vmem>>, vector<128x128xbf16>
    %c0_1 = arith.constant 0 : index
    %c0_2 = arith.constant 0 : index
    %1 = vector.load %arg2[%c0_1, %c0_2] : memref<128x128xbf16, #tpu.memory_space<vmem>>, vector<128x128xbf16>
    %cst = arith.constant dense<0.000000e+00> : vector<128x128xf32>
    %2 = tpu.matmul %0, %1, %cst {dimension_numbers = #tpu.dot_dimension_numbers<[1], [0], [0], [1], [0, 0, 1, 1], [], []>} : vector<128x128xbf16>, vector<128x128xbf16>, vector<128x128xf32> -> vector<128x128xf32>
    %c0_3 = arith.constant 0 : index
    %c0_4 = arith.constant 0 : index
    %3 = vector.load %arg3[%c0_3, %c0_4] : memref<128x1xf32, #tpu.memory_space<vmem>>, vector<128x1xf32>
    %4 = vector.broadcast %3 : vector<128x1xf32> to vector<128x128xf32>
    %5 = arith.mulf %2, %4 : vector<128x128xf32>
    %6 = arith.truncf %5 : vector<128x128xf32> to vector<128x128xbf16>
    %c0_5 = arith.constant 0 : index
    %c0_6 = arith.constant 0 : index
    %7 = vector.load %arg4[%c0_5, %c0_6] : memref<128x128xbf16, #tpu.memory_space<vmem>>, vector<128x128xbf16>
    tpu.vector_store %arg4[%c0_5, %c0_6], %6 {strides = array<i32>} : memref<128x128xbf16, #tpu.memory_space<vmem>>, vector<128x128xbf16>,
    return
  }
  func.func @transform_0(%arg0: i32) -> (i32, i32) {
    %c0_i32 = arith.constant 0 : i32
    %c0_i32_0 = arith.constant 0 : i32
    return %arg0, %c0_i32 : i32, i32
  }
  func.func @transform_1(%arg0: i32) -> (i32, i32) {
    %c0_i32 = arith.constant 0 : i32
    %c0_i32_0 = arith.constant 0 : i32
    %c0_i32_1 = arith.constant 0 : i32
    return %c0_i32, %c0_i32_0 : i32, i32
  }
  func.func @transform_2(%arg0: i32) -> (i32, i32) {
    %c0_i32 = arith.constant 0 : i32
    %c0_i32_0 = arith.constant 0 : i32
    return %arg0, %c0_i32 : i32, i32
  }
  func.func @transform_3(%arg0: i32) -> (i32, i32) {
    %c0_i32 = arith.constant 0 : i32
    %c0_i32_0 = arith.constant 0 : i32
    return %arg0, %c0_i32 : i32, i32
  }
}

</mosaic_0001>

<bundles_post_ra>
// kernel: tpu_custom_call.1
= control target key start
LH: loop header
LB: loop body
LE: loop exit
PB: predicated region body
PF: predicated region fallthrough
CT: control target
= control target key end

     0   :  { %v654_v2 = vmov 0   ;;  %s786_s0 = inlined_call_operand.vmem [shape: bf16[128,128], index: 0, kind: input, shape index: {}]   ;;  %s787_s1 = inlined_call_operand.vmem [shape: bf16[128,128], index: 1, kind: input, shape index: {}]   ;;  %s788_s2 = inlined_call_operand.vmem [shape: f32[128,1], index: 2, kind: input, shape index: {}]   ;;  %s789_s3 = inlined_call_operand.hbm [shape: bf16[128,128], index: 3, kind: output, shape index: {}]  }
   0x1   :  { %v614_v0 = vld [vmem:[%s787_s1] sm:$0xff]   ;;  %v615_v1 = vld [vmem:[%s787_s1 + $0x8] sm:$0xff]   ;;  %613 = vset.pattern.permute.xlu1 %v654_v2  ;;  %612 = vset.pattern.permute.xlu0 %v654_v2  ;;  %v616_v3 = vld [vmem:[%s787_s1 + $0x10] sm:$0xff]  }
   0x2   :  { %560 = vmatprep.subr.bf16.mxu0 %v614_v0  ;;  %592 = vmatprep.subr.bf16.mxu1 %v614_v0  ;;  %v617_v4 = vld [vmem:[%s787_s1 + $0x18] sm:$0xff]   ;;  %v622_v5 = vld [vmem:[%s786_s0] sm:$0xff]   ;;  %v619_v8 = vld [vmem:[%s787_s1 + $0x28] sm:$0xff]  }
   0x3   :  { %561 = vmatpush3.bf16.msra.mxu0 %v614_v0  ;;  %600 = vmatpush3.bf16.msra.mxu1 %v614_v0  ;;  %v623_v6 = vld [vmem:[%s786_s0 + $0x20] sm:$0xff]   ;;  %v243_v9 = vld [vmem:[%s788_s2 + $0x10] sm:$0xff]  ;;  %v244_v11 = vld [vmem:[%s788_s2 + $0x18] sm:$0xff] }
   0x4   :  { %562 = vmatprep.subr.bf16.mxu0 %v615_v1  ;;  %593 = vmatprep.subr.bf16.mxu1 %v615_v1  ;;  %v618_v7 = vld [vmem:[%s787_s1 + $0x20] sm:$0xff]   ;;  %v242_v12 = vld [vmem:[%s788_s2 + $0x8] sm:$0xff]  ;;  %v620_v13 = vld [vmem:[%s787_s1 + $0x30] sm:$0xff]  }
   0x5   :  { %576 = vmatprep.mubr.bf16.mxu0 %v622_v5  ;;  %584 = vmatprep.mubr.bf16.mxu1 %v623_v6  ;;  %v241_v10 = vld [vmem:[%s788_s2] sm:$0xff] }
   0x6   :  { %269 = vperm.xlu1 %613, %v243_v9   ;;  %259 = vperm.xlu0 %612, %v241_v10  }
   0x7   :  { %563 = vmatpush3.bf16.msra.mxu0 %v615_v1  ;;  %601 = vmatpush3.bf16.msra.mxu1 %v615_v1 }
   0x8   :  { %564 = vmatprep.subr.bf16.mxu0 %v616_v3  ;;  %594 = vmatprep.subr.bf16.mxu1 %v616_v3 }
   0xa   :  { %274 = vperm.xlu1 %613, %v244_v11   ;;  %264 = vperm.xlu0 %612, %v242_v12  }
   0xb   :  { %565 = vmatpush3.bf16.msra.mxu0 %v616_v3  ;;  %602 = vmatpush3.bf16.msra.mxu1 %v616_v3 }
   0xc   :  { %566 = vmatprep.subr.bf16.mxu0 %v617_v4  ;;  %595 = vmatprep.subr.bf16.mxu1 %v617_v4 }
   0xf   :  { %567 = vmatpush3.bf16.msra.mxu0 %v617_v4  ;;  %603 = vmatpush3.bf16.msra.mxu1 %v617_v4 }
  0x10   :  { %568 = vmatprep.subr.bf16.mxu0 %v618_v7  ;;  %596 = vmatprep.subr.bf16.mxu1 %v618_v7 }
  0x13   :  { %569 = vmatpush3.bf16.msra.mxu0 %v618_v7  ;;  %604 = vmatpush3.bf16.msra.mxu1 %v618_v7 }
  0x14   :  { %570 = vmatprep.subr.bf16.mxu0 %v619_v8  ;;  %597 = vmatprep.subr.bf16.mxu1 %v619_v8 }
  0x15   :  { %8 = vsyncpa [#allocation3], 0  ;;  %v246_v14 = vld [vmem:[%s788_s2 + $0x28] sm:$0xff]  ;;  %v245_v15 = vld [vmem:[%s788_s2 + $0x20] sm:$0xff] }
  0x16   :  { %v621_v16 = vld [vmem:[%s787_s1 + $0x38] sm:$0xff]   ;;  %284 = vperm.xlu1 %613, %v246_v14   ;;  %279 = vperm.xlu0 %612, %v245_v15   ;;  %v247_v18 = vld [vmem:[%s788_s2 + $0x30] sm:$0xff]  ;;  %v624_v19 = vld [vmem:[%s786_s0 + $0x8] sm:$0xff]  }
  0x17   :  { %571 = vmatpush3.bf16.msra.mxu0 %v619_v8  ;;  %605 = vmatpush3.bf16.msra.mxu1 %v619_v8  ;;  %v248_v17 = vld [vmem:[%s788_s2 + $0x38] sm:$0xff]  ;;  %v625_v20 = vld [vmem:[%s786_s0 + $0x28] sm:$0xff]   ;;  %v249_v22 = vld [vmem:[%s788_s2 + $0x40] sm:$0xff] }
  0x18   :  { %572 = vmatprep.subr.bf16.mxu0 %v620_v13  ;;  %598 = vmatprep.subr.bf16.mxu1 %v620_v13  ;;  %v250_v21 = vld [vmem:[%s788_s2 + $0x48] sm:$0xff]  ;;  %v626_v23 = vld [vmem:[%s786_s0 + $0x10] sm:$0xff]   ;;  %v252_v25 = vld [vmem:[%s788_s2 + $0x58] sm:$0xff] }
  0x19   :  { %v627_v24 = vld [vmem:[%s786_s0 + $0x30] sm:$0xff]   ;;  %v628_v27 = vld [vmem:[%s786_s0 + $0x18] sm:$0xff]   ;;  %v254_v29 = vld [vmem:[%s788_s2 + $0x68] sm:$0xff] }
  0x1a   :  { %294 = vperm.xlu1 %613, %v248_v17   ;;  %289 = vperm.xlu0 %612, %v247_v18   ;;  %v251_v26 = vld [vmem:[%s788_s2 + $0x50] sm:$0xff]  ;;  %v629_v28 = vld [vmem:[%s786_s0 + $0x38] sm:$0xff]   ;;  %v253_v30 = vld [vmem:[%s788_s2 + $0x60] sm:$0xff]  ;;  %s655_s0 = smov [#allocation2]  }
  0x1b   :  { %573 = vmatpush3.bf16.msra.mxu0 %v620_v13  ;;  %606 = vmatpush3.bf16.msra.mxu1 %v620_v13  ;;  %v256_v31 = vld [vmem:[%s788_s2 + $0x78] sm:$0xff]  ;;  %v255_v32 = vld [vmem:[%s788_s2 + $0x70] sm:$0xff]  ;;  %s438_s2 = sshll.u32 %s655_s0, 4  ;;  %s439_s2 = int_to_ptr.vmem [resolvable:$true] %s438_s2 }
  0x1c   :  { %574 = vmatprep.subr.bf16.mxu0 %v621_v16  ;;  %599 = vmatprep.subr.bf16.mxu1 %v621_v16  ;;  %s630_s21 = scalar_lea.vmem %s439_s2, 1024  ;;  %p635_p1 = scmp.lt.s32.totalorder %s439_s2, %s439_s2 }
  0x1d   :  { %p631_p0 = scmp.ne.s32.totalorder %s439_s2, %s630_s21  ;;  %p636_p2 = scmp.lt.s32.totalorder %s630_s21, %s630_s21 }
  0x1e   :  { %304 = vperm.xlu1 %613, %v250_v21   ;;  %299 = vperm.xlu0 %612, %v249_v22  }
  0x1f   :  { %575 = vmatpush3.bf16.msra.mxu0 %v621_v16  ;;  %607 = vmatpush3.bf16.msra.mxu1 %v621_v16  ;;  %p637_p3 = por %p636_p2, %p635_p1 }
  0x21   :  { %p638_p4 = pnand %p637_p3, %p631_p0 }
  0x22   :  { %577 = vmatmul.mubr.bf16.vlgmr.msra.gmra.mrb[0].mxu0 %v624_v19  ;;  %585 = vmatmul.mubr.bf16.vlgmr.msra.gmra.mrb[0].mxu1 %v625_v20 }
  0x23   :  { %580 = vmatprep.mubr.bf16.mxu0 %v626_v23  ;;  %588 = vmatprep.mubr.bf16.mxu1 %v627_v24 }
  0x24   :  { %314 = vperm.xlu1 %613, %v252_v25   ;;  %309 = vperm.xlu0 %612, %v251_v26  }
  0x28   :  { %324 = vperm.xlu1 %613, %v254_v29   ;;  %319 = vperm.xlu0 %612, %v253_v30  }
  0x2a   :  { %581 = vmatmul.mubr.bf16.gmra.mrb[4].mxu0 %v628_v27  ;;  %589 = vmatmul.mubr.bf16.gmra.mrb[4].mxu1 %v629_v28 }
  0x2c   :  { %334 = vperm.xlu1 %613, %v256_v31   ;;  %329 = vperm.xlu0 %612, %v255_v32  }
  0x85   :  { %v270_v33 = vpop.permute.xlu1 %269  ;;  %v260_v34 = vpop.permute.xlu0 %259 }
  0x89   :  { %v275_v35 = vpop.permute.xlu1 %274  ;;  %v265_v36 = vpop.permute.xlu0 %264 }
  0x95   :  { %v285_v37 = vpop.permute.xlu1 %284  ;;  %v280_v38 = vpop.permute.xlu0 %279 }
  0x99   :  { %v295_v39 = vpop.permute.xlu1 %294  ;;  %v290_v40 = vpop.permute.xlu0 %289 }
  0x9d   :  { %v305_v41 = vpop.permute.xlu1 %304  ;;  %v300_v42 = vpop.permute.xlu0 %299 }
  0xa3   :  { %v315_v43 = vpop.permute.xlu1 %314  ;;  %v310_v44 = vpop.permute.xlu0 %309 }
  0xa7   :  { %v325_v45 = vpop.permute.xlu1 %324  ;;  %v320_v46 = vpop.permute.xlu0 %319 }
  0xab   :  { %v335_v3 = vpop.permute.xlu1 %334  ;;  %v330_v4 = vpop.permute.xlu0 %329 }
  0xf5   :  { %v578_v47 = vpop.f32.mrb[0].mxu0  ;;  %v586_v48 = vpop.f32.mrb[0].mxu1 }
  0xf6   :  { %v178_v49 = vpop.f32.mrb[1].mxu0  ;;  %v210_v50 = vpop.f32.mrb[1].mxu1  ;;  %v339_v53 = vmul.f32 %v578_v47, %v270_v33  ;;  %v347_v54 = vmul.f32 %v586_v48, %v310_v44 }
  0xf7   :  { %v579_v51 = vpop.f32.mrb[2].mxu0  ;;  %v587_v52 = vpop.f32.mrb[2].mxu1  ;;  %v337_v59 = vmul.f32 %v260_v34, %v178_v49  ;;  %v345_v60 = vmul.f32 %v300_v42, %v210_v50 }
  0xf8   :  { %v340_v55 = vmul.f32 %v579_v51, %v275_v35  ;;  %v348_v56 = vmul.f32 %v587_v52, %v315_v43  ;;  %v181_v57 = vpop.f32.mrb[3].mxu0  ;;  %v213_v58 = vpop.f32.mrb[3].mxu1 }
  0xf9   :  { %v338_v61 = vmul.f32 %v265_v36, %v181_v57  ;;  %v346_v62 = vmul.f32 %v305_v41, %v213_v58 }
  0xfa   :  { %v505_v63 = vpack.c.bf16 %v340_v55, %v339_v53  ;;  %v525_v0 = vpack.c.bf16 %v348_v56, %v347_v54 }
  0xfb   :  { %v500_v1 = vpack.c.bf16 %v338_v61, %v337_v59  ;;  %v520_v2 = vpack.c.bf16 %v346_v62, %v345_v60 }
  0xfc   :  { %537 = vst [vmem:[#allocation2 + $0x8] sm:$0xff] %v505_v63   ;;  %541 = vst [vmem:[#allocation2 + $0x28] sm:$0xff] %v525_v0  }
  0xfd   :  { %501 = vst [vmem:[#allocation2] sm:$0xff] %v500_v1   ;;  %540 = vst [vmem:[#allocation2 + $0x20] sm:$0xff] %v520_v2   ;;  %v582_v5 = vpop.f32.mrb[4].mxu0  ;;  %v590_v6 = vpop.f32.mrb[4].mxu1 }
  0xfe   :  { %v194_v7 = vpop.f32.mrb[5].mxu0  ;;  %v226_v8 = vpop.f32.mrb[5].mxu1  ;;  %v343_v11 = vmul.f32 %v582_v5, %v290_v40  ;;  %v351_v12 = vmul.f32 %v590_v6, %v330_v4 }
  0xff   :  { %v583_v9 = vpop.f32.mrb[6].mxu0  ;;  %v591_v10 = vpop.f32.mrb[6].mxu1  ;;  %v341_v17 = vmul.f32 %v280_v38, %v194_v7  ;;  %v349_v18 = vmul.f32 %v320_v46, %v226_v8 }
 0x100   :  { %v344_v13 = vmul.f32 %v583_v9, %v295_v39  ;;  %v352_v14 = vmul.f32 %v591_v10, %v335_v3  ;;  %v197_v15 = vpop.f32.mrb[7].mxu0  ;;  %v229_v16 = vpop.f32.mrb[7].mxu1 }
 0x101   :  { %v342_v19 = vmul.f32 %v285_v37, %v197_v15  ;;  %v350_v20 = vmul.f32 %v325_v45, %v229_v16 }
 0x102   :  { %v515_v21 = vpack.c.bf16 %v344_v13, %v343_v11  ;;  %v535_v22 = vpack.c.bf16 %v352_v14, %v351_v12 }
 0x103   :  { %v510_v23 = vpack.c.bf16 %v342_v19, %v341_v17  ;;  %v530_v24 = vpack.c.bf16 %v350_v20, %v349_v18 }
 0x104   :  { %539 = vst [vmem:[#allocation2 + $0x18] sm:$0xff] %v515_v21   ;;  %543 = vst [vmem:[#allocation2 + $0x38] sm:$0xff] %v535_v22  }
 0x105   :  { %538 = vst [vmem:[#allocation2 + $0x10] sm:$0xff] %v510_v23   ;;  %542 = vst [vmem:[#allocation2 + $0x30] sm:$0xff] %v530_v24  }
 0x106   :  { %641 = shalt.err (!%p638_p4)
}
 0x107   :  { %s642_s23 = scalar_lea.hbm %s789_s3, 1024 }
 0x108   :  { %p643_p5 = scmp.ne.s32.totalorder %s789_s3, %s642_s23  ;;  %p646_p6 = scmp.lt.u32.totalorder %s642_s23, %s789_s3 }
 0x10a   :  { %p648_p7 = pnand %p646_p6, %p643_p5 }
 0x10c   :  { %651 = shalt.err (!%p648_p7)
}
 0x10d   :  { %s656_s28 = smov 64   ;;  %s657_s29 = smov 4  }
 0x10e   :  { %444 = dma.vmem_to_hbm [thread:$0]  %s439_s2, 1024, %s789_s3, [#allocation3], %s656_s28, %s656_s28, %s657_s29  }
 0x10f   :  { %652 = dma.done.wait [#allocation3], 1024  }
 0x110   :  { %653 = vsyncadd [#allocation3], 4294966272 }
 0x111   :  { %448 = vsyncpa [#allocation3], 1 }

</bundles_post_ra>
